<compile_context>
chip_gen: v7x
topology: tpu7x:2x2x1
jax: 0.10.0
libtpu: 0.0.40
codegen_flags: <defaults>
</compile_context>

<pallas_src>
import functools

import jax
import jax.numpy as jnp
from jax.experimental import pallas as pl
from jax.experimental.pallas import tpu as pltpu


def _score_mixer_kernel(*refs, n_scores: int, n_items: int, use_swish: bool):
    score_refs = refs[:n_scores]                   # each (TB, n_items)        VMEM
    (temb_ref,                                     # (TB, embed_dim)           VMEM
     wstack_ref,                                   # (H*n_items, embed_dim)    VMEM
     bstack_ref,                                   # (H*n_items, 1)            VMEM
     wh_ref,                                       # (H, H)  torch (out, in)   SMEM
     wout_ref,                                     # (H,)                      SMEM
     bout_ref,                                     # (1,)                      SMEM
     out_ref) = refs[n_scores:]                    # (n_items, TB)             VMEM

    H = n_scores + 1

    # Lane-major score channels: (TB, n_items) -> (n_items, TB) on the XLU.
    chans = [jnp.transpose(r[...]).astype(jnp.float32) for r in score_refs]

    # Folded time-embedding projection for every hidden channel on the MXU:
    #   (H*n_items, embed_dim) @ (embed_dim, TB) -> (H*n_items, TB)
    temb_t = jnp.transpose(temb_ref[...].astype(jnp.float32))     # (embed_dim, TB)
    proj_all = jnp.dot(wstack_ref[...], temb_t,
                       preferred_element_type=jnp.float32)
    proj_all = proj_all + bstack_ref[...]          # fused wh[:,H-1]*b_proj + b_hidden

    # hidden Linear(H, H) + swish + out Linear(H, 1), unrolled over the tiny H dim.
    y = None
    for j in range(H):
        hj = proj_all[j * n_items:(j + 1) * n_items, :]
        for i in range(n_scores):
            hj = hj + chans[i] * wh_ref[j, i]      # scalar-broadcast MAC (VPU)
        if use_swish:
            hj = hj * jax.nn.sigmoid(hj)           # EUP slot
        term = hj * wout_ref[j]
        y = term if y is None else y + term
    y = y + bout_ref[0]

    out_ref[...] = y.astype(out_ref.dtype)


def _vmem_budgets():
    """(tile-sizing budget, scoped vmem limit) chosen per TPU generation."""
    try:
        cap = int(getattr(pltpu.get_tpu_info(), "vmem_capacity_bytes", 128 << 20))
    except Exception:
        cap = 128 << 20
    budget = min(cap // 4, 24 << 20)     # ~24 MiB on v5e/v6e, ~16 MiB on v7x
    limit = min(cap // 2, 32 << 20)      # explicit scoped-VMEM limit with headroom
    return budget, limit


def _choose_batch_tile(B, n_scores, n_items, embed_dim, budget_bytes):
    """Lane-axis batch tile: multiple of 128, double-buffered footprint under budget,
    and >= 2 grid steps whenever the batch allows (v7x megacore / DMA overlap)."""
    per_col = 4 * (n_scores * n_items + embed_dim + n_items)   # f32 bytes streamed per column
    tb = (budget_bytes // (2 * max(per_col, 1))) // 128 * 128
    tb = max(128, min(tb, 16384))
    b_ceil = -(-B // 128) * 128
    tb = min(tb, b_ceil)
    if b_ceil >= 256 and tb > b_ceil // 2:          # keep at least 2 grid steps
        tb = max(128, (b_ceil // 2) // 128 * 128)
    return tb


def score_mixer_forward(inputs, params, activation="swish"):
    """inputs = [score_0, ..., score_{n-1}, t_embed]; scores (B, n_items), t_embed (B, embed_dim)."""
    *score_list, t_embed = inputs
    n_scores = len(score_list)
    B, n_items = score_list[0].shape
    embed_dim = t_embed.shape[-1]
    H = n_scores + 1

    budget, vmem_limit = _vmem_budgets()
    TB = _choose_batch_tile(B, n_scores, n_items, embed_dim, budget)
    grid = (pl.cdiv(B, TB),)
    B_pad = grid[0] * TB            # output is allocated padded; tail columns discarded

    f32 = jnp.float32
    w_proj = params["w_proj"].astype(f32)                     # (n_items, embed_dim)
    b_proj = params["b_proj"].astype(f32)                     # (n_items,)
    w_hidden = params["w_hidden"].astype(f32)                 # (H, H)   torch (out, in)
    b_hidden = params["b_hidden"].astype(f32)                 # (H,)
    w_out = params["w_out"].astype(f32)                       # (H,)
    b_out = params["b_out"].astype(f32).reshape(1)            # (1,)

    # Fold the hidden-weight column acting on the time projection into the projection:
    #   wstack[j*n_items + k, :] = w_hidden[j, H-1] * w_proj[k, :]
    #   bstack[j*n_items + k]    = w_hidden[j, H-1] * b_proj[k] + b_hidden[j]
    wt = w_hidden[:, H - 1]
    w_stack = (wt[:, None, None] * w_proj[None]).reshape(H * n_items, embed_dim)
    b_stack = (wt[:, None] * b_proj[None, :] + b_hidden[:, None]).reshape(H * n_items, 1)

    in_specs = [pl.BlockSpec((TB, n_items), lambda b: (b, 0))
                for _ in range(n_scores)]
    in_specs += [
        pl.BlockSpec((TB, embed_dim), lambda b: (b, 0)),             # t_embed
        pl.BlockSpec((H * n_items, embed_dim), lambda b: (0, 0)),    # w_stack
        pl.BlockSpec((H * n_items, 1), lambda b: (0, 0)),            # b_stack
        pl.BlockSpec(memory_space=pltpu.SMEM),                       # w_hidden
        pl.BlockSpec(memory_space=pltpu.SMEM),                       # w_out
        pl.BlockSpec(memory_space=pltpu.SMEM),                       # b_out
    ]
    out_specs = pl.BlockSpec((n_items, TB), lambda b: (0, b))

    kernel = functools.partial(_score_mixer_kernel, n_scores=n_scores,
                               n_items=n_items,
                               use_swish=(activation == "swish"))

    out_t = pl.pallas_call(
        kernel,
        out_shape=jax.ShapeDtypeStruct((n_items, B_pad), jnp.float32),
        grid_spec=pltpu.PrefetchScalarGridSpec(
            num_scalar_prefetch=0,
            grid=grid,
            in_specs=in_specs,
            out_specs=out_specs,
        ),
        compiler_params=pltpu.CompilerParams(
            dimension_semantics=("parallel",),
            vmem_limit_bytes=vmem_limit),
    )(*[s.astype(f32) for s in score_list], t_embed.astype(f32),
      w_stack, b_stack, w_hidden, w_out, b_out)

    # Output kept lane-major inside the kernel (unmasked stores); small transpose here.
    return jnp.transpose(out_t)[:B]                            # (B, n_items)


def score_mixer_reference(inputs, params, activation="swish"):
    """Pure-JAX reference mirroring the PyTorch forward."""
    *score_list, t_embed = inputs
    t_proj = t_embed @ params["w_proj"].T + params["b_proj"]          # (B, n_items)
    x = jnp.stack(score_list, axis=-1)                                # (B, n_items, n_scores)
    x = jnp.concatenate([x, t_proj[..., None]], axis=-1)              # (B, n_items, H)
    x = x @ params["w_hidden"].T + params["b_hidden"]                 # hidden Linear(H, H)
    if activation == "swish":
        x = x * jax.nn.sigmoid(x)
    x = x @ params["w_out"][:, None] + params["b_out"]                # out Linear(H, 1)
    return jnp.squeeze(x, axis=-1)


if __name__ == "__main__":
    # Small, forward-consistent shapes: hidden_dim = n_scores + 1
    batch, n_items, embed_dim, n_scores = 2, 16, 32, 3
    hidden_dim = n_scores + 1

    key = jax.random.PRNGKey(0)
    keys = jax.random.split(key, 10)

    # inputs: n_scores score tensors (B, n_items) + time embedding (B, embed_dim)
    inputs = [jax.random.normal(keys[i], (batch, n_items), jnp.float32)
              for i in range(n_scores)]
    inputs.append(jax.random.normal(keys[n_scores], (batch, embed_dim), jnp.float32))

    # deterministic synthetic parameters in PyTorch nn.Linear (out, in) layouts
    params = {
        "w_proj":   0.1 * jax.random.normal(keys[4], (n_items, embed_dim), jnp.float32),
        "b_proj":   0.1 * jax.random.normal(keys[5], (n_items,), jnp.float32),
        "w_hidden": 0.1 * jax.random.normal(keys[6], (hidden_dim, hidden_dim), jnp.float32),
        "b_hidden": 0.1 * jax.random.normal(keys[7], (hidden_dim,), jnp.float32),
        "w_out":    0.1 * jax.random.normal(keys[8], (hidden_dim,), jnp.float32),
        "b_out":    0.1 * jax.random.normal(keys[9], (1,), jnp.float32),
    }

    out = score_mixer_forward(inputs, params, activation="swish")
    out = jax.block_until_ready(out)

    ref = score_mixer_reference(inputs, params, activation="swish")
    assert out.shape == (batch, n_items), out.shape
    assert jnp.allclose(out, ref, atol=1e-5, rtol=1e-5), (out, ref)

    print("KERNEL_OK")
</pallas_src>

<mosaic_0001>
module attributes {stable_mosaic.version = 11 : i64} {
  func.func @_score_mixer_kernel(%arg0: i32, %arg1: memref<128x16xf32, #tpu.memory_space<vmem>>, %arg2: memref<128x16xf32, #tpu.memory_space<vmem>>, %arg3: memref<128x16xf32, #tpu.memory_space<vmem>>, %arg4: memref<128x32xf32, #tpu.memory_space<vmem>>, %arg5: memref<64x32xf32, #tpu.memory_space<vmem>>, %arg6: memref<64x1xf32, #tpu.memory_space<vmem>>, %arg7: memref<4x4xf32, #tpu.memory_space<smem>>, %arg8: memref<4xf32, #tpu.memory_space<smem>>, %arg9: memref<1xf32, #tpu.memory_space<smem>>, %arg10: memref<16x128xf32, #tpu.memory_space<vmem>>) attributes {dimension_semantics = [#tpu.dimension_semantics<parallel>], iteration_bounds = array<i64: 1>, scalar_prefetch = 0 : i64, scratch_operands = 0 : i64, tpu.core_type = #tpu.core_type<tc>, window_params = [{transform_indices = @transform_0, window_bounds = array<i64: 128, 16>}, {transform_indices = @transform_1, window_bounds = array<i64: 128, 16>}, {transform_indices = @transform_2, window_bounds = array<i64: 128, 16>}, {transform_indices = @transform_3, window_bounds = array<i64: 128, 32>}, {pipeline_mode = #tpu.pipeline_mode<synchronous>, transform_indices = @transform_4, window_bounds = array<i64: 64, 32>}, {pipeline_mode = #tpu.pipeline_mode<synchronous>, transform_indices = @transform_5, window_bounds = array<i64: 64, 1>}, {transform_indices = @transform_6, window_bounds = array<i64: 4, 4>}, {transform_indices = @transform_7, window_bounds = array<i64: 4>}, {transform_indices = @transform_8, window_bounds = array<i64: 1>}, {transform_indices = @transform_9, window_bounds = array<i64: 16, 128>}]} {
    %c0 = arith.constant 0 : index
    %c0_0 = arith.constant 0 : index
    %0 = vector.load %arg1[%c0, %c0_0] : memref<128x16xf32, #tpu.memory_space<vmem>>, vector<128x16xf32>
    %1 = tpu.transpose %0, [1, 0] : vector<128x16xf32> -> vector<16x128xf32>
    %c0_1 = arith.constant 0 : index
    %c0_2 = arith.constant 0 : index
    %2 = vector.load %arg2[%c0_1, %c0_2] : memref<128x16xf32, #tpu.memory_space<vmem>>, vector<128x16xf32>
    %3 = tpu.transpose %2, [1, 0] : vector<128x16xf32> -> vector<16x128xf32>
    %c0_3 = arith.constant 0 : index
    %c0_4 = arith.constant 0 : index
    %4 = vector.load %arg3[%c0_3, %c0_4] : memref<128x16xf32, #tpu.memory_space<vmem>>, vector<128x16xf32>
    %5 = tpu.transpose %4, [1, 0] : vector<128x16xf32> -> vector<16x128xf32>
    %c0_5 = arith.constant 0 : index
    %c0_6 = arith.constant 0 : index
    %6 = vector.load %arg4[%c0_5, %c0_6] : memref<128x32xf32, #tpu.memory_space<vmem>>, vector<128x32xf32>
    %7 = tpu.transpose %6, [1, 0] : vector<128x32xf32> -> vector<32x128xf32>
    %c0_7 = arith.constant 0 : index
    %c0_8 = arith.constant 0 : index
    %8 = vector.load %arg5[%c0_7, %c0_8] : memref<64x32xf32, #tpu.memory_space<vmem>>, vector<64x32xf32>
    %cst = arith.constant dense<0.000000e+00> : vector<64x128xf32>
    %9 = tpu.matmul %8, %7, %cst {dimension_numbers = #tpu.dot_dimension_numbers<[1], [0], [0], [1], [0, 0, 1, 1], [], []>} : vector<64x32xf32>, vector<32x128xf32>, vector<64x128xf32> -> vector<64x128xf32>
    %c0_9 = arith.constant 0 : index
    %c0_10 = arith.constant 0 : index
    %10 = vector.load %arg6[%c0_9, %c0_10] : memref<64x1xf32, #tpu.memory_space<vmem>>, vector<64x1xf32>
    %11 = vector.broadcast %10 : vector<64x1xf32> to vector<64x128xf32>
    %12 = arith.addf %9, %11 : vector<64x128xf32>
    %13 = vector.extract_strided_slice %12 {offsets = [0, 0], sizes = [16, 128], strides = [1, 1]} : vector<64x128xf32> to vector<16x128xf32>
    %c0_11 = arith.constant 0 : index
    %c0_12 = arith.constant 0 : index
    %14 = memref.load %arg7[%c0_11, %c0_12] : memref<4x4xf32, #tpu.memory_space<smem>>
    %15 = vector.broadcast %14 : f32 to vector<16x128xf32>
    %16 = arith.mulf %1, %15 : vector<16x128xf32>
    %17 = arith.addf %13, %16 : vector<16x128xf32>
    %c0_13 = arith.constant 0 : index
    %c1 = arith.constant 1 : index
    %18 = memref.load %arg7[%c0_13, %c1] : memref<4x4xf32, #tpu.memory_space<smem>>
    %19 = vector.broadcast %18 : f32 to vector<16x128xf32>
    %20 = arith.mulf %3, %19 : vector<16x128xf32>
    %21 = arith.addf %17, %20 : vector<16x128xf32>
    %c0_14 = arith.constant 0 : index
    %c2 = arith.constant 2 : index
    %22 = memref.load %arg7[%c0_14, %c2] : memref<4x4xf32, #tpu.memory_space<smem>>
    %23 = vector.broadcast %22 : f32 to vector<16x128xf32>
    %24 = arith.mulf %5, %23 : vector<16x128xf32>
    %25 = arith.addf %21, %24 : vector<16x128xf32>
    %26 = arith.negf %25 : vector<16x128xf32>
    %27 = math.exp %26 : vector<16x128xf32>
    %cst_15 = arith.constant 1.000000e+00 : f32
    %28 = vector.broadcast %cst_15 : f32 to vector<16x128xf32>
    %29 = arith.addf %28, %27 : vector<16x128xf32>
    %30 = arith.divf %28, %29 : vector<16x128xf32>
    %31 = arith.mulf %25, %30 : vector<16x128xf32>
    %c0_16 = arith.constant 0 : index
    %32 = memref.load %arg8[%c0_16] : memref<4xf32, #tpu.memory_space<smem>>
    %33 = vector.broadcast %32 : f32 to vector<16x128xf32>
    %34 = arith.mulf %31, %33 : vector<16x128xf32>
    %35 = vector.extract_strided_slice %12 {offsets = [16, 0], sizes = [16, 128], strides = [1, 1]} : vector<64x128xf32> to vector<16x128xf32>
    %c1_17 = arith.constant 1 : index
    %c0_18 = arith.constant 0 : index
    %36 = memref.load %arg7[%c1_17, %c0_18] : memref<4x4xf32, #tpu.memory_space<smem>>
    %37 = vector.broadcast %36 : f32 to vector<16x128xf32>
    %38 = arith.mulf %1, %37 : vector<16x128xf32>
    %39 = arith.addf %35, %38 : vector<16x128xf32>
    %c1_19 = arith.constant 1 : index
    %c1_20 = arith.constant 1 : index
    %40 = memref.load %arg7[%c1_19, %c1_20] : memref<4x4xf32, #tpu.memory_space<smem>>
    %41 = vector.broadcast %40 : f32 to vector<16x128xf32>
    %42 = arith.mulf %3, %41 : vector<16x128xf32>
    %43 = arith.addf %39, %42 : vector<16x128xf32>
    %c1_21 = arith.constant 1 : index
    %c2_22 = arith.constant 2 : index
    %44 = memref.load %arg7[%c1_21, %c2_22] : memref<4x4xf32, #tpu.memory_space<smem>>
    %45 = vector.broadcast %44 : f32 to vector<16x128xf32>
    %46 = arith.mulf %5, %45 : vector<16x128xf32>
    %47 = arith.addf %43, %46 : vector<16x128xf32>
    %48 = arith.negf %47 : vector<16x128xf32>
    %49 = math.exp %48 : vector<16x128xf32>
    %cst_23 = arith.constant 1.000000e+00 : f32
    %50 = vector.broadcast %cst_23 : f32 to vector<16x128xf32>
    %51 = arith.addf %50, %49 : vector<16x128xf32>
    %52 = arith.divf %50, %51 : vector<16x128xf32>
    %53 = arith.mulf %47, %52 : vector<16x128xf32>
    %c1_24 = arith.constant 1 : index
    %54 = memref.load %arg8[%c1_24] : memref<4xf32, #tpu.memory_space<smem>>
    %55 = vector.broadcast %54 : f32 to vector<16x128xf32>
    %56 = arith.mulf %53, %55 : vector<16x128xf32>
    %57 = arith.addf %34, %56 : vector<16x128xf32>
    %58 = vector.extract_strided_slice %12 {offsets = [32, 0], sizes = [16, 128], strides = [1, 1]} : vector<64x128xf32> to vector<16x128xf32>
    %c2_25 = arith.constant 2 : index
    %c0_26 = arith.constant 0 : index
    %59 = memref.load %arg7[%c2_25, %c0_26] : memref<4x4xf32, #tpu.memory_space<smem>>
    %60 = vector.broadcast %59 : f32 to vector<16x128xf32>
    %61 = arith.mulf %1, %60 : vector<16x128xf32>
    %62 = arith.addf %58, %61 : vector<16x128xf32>
    %c2_27 = arith.constant 2 : index
    %c1_28 = arith.constant 1 : index
    %63 = memref.load %arg7[%c2_27, %c1_28] : memref<4x4xf32, #tpu.memory_space<smem>>
    %64 = vector.broadcast %63 : f32 to vector<16x128xf32>
    %65 = arith.mulf %3, %64 : vector<16x128xf32>
    %66 = arith.addf %62, %65 : vector<16x128xf32>
    %c2_29 = arith.constant 2 : index
    %c2_30 = arith.constant 2 : index
    %67 = memref.load %arg7[%c2_29, %c2_30] : memref<4x4xf32, #tpu.memory_space<smem>>
    %68 = vector.broadcast %67 : f32 to vector<16x128xf32>
    %69 = arith.mulf %5, %68 : vector<16x128xf32>
    %70 = arith.addf %66, %69 : vector<16x128xf32>
    %71 = arith.negf %70 : vector<16x128xf32>
    %72 = math.exp %71 : vector<16x128xf32>
    %cst_31 = arith.constant 1.000000e+00 : f32
    %73 = vector.broadcast %cst_31 : f32 to vector<16x128xf32>
    %74 = arith.addf %73, %72 : vector<16x128xf32>
    %75 = arith.divf %73, %74 : vector<16x128xf32>
    %76 = arith.mulf %70, %75 : vector<16x128xf32>
    %c2_32 = arith.constant 2 : index
    %77 = memref.load %arg8[%c2_32] : memref<4xf32, #tpu.memory_space<smem>>
    %78 = vector.broadcast %77 : f32 to vector<16x128xf32>
    %79 = arith.mulf %76, %78 : vector<16x128xf32>
    %80 = arith.addf %57, %79 : vector<16x128xf32>
    %81 = vector.extract_strided_slice %12 {offsets = [48, 0], sizes = [16, 128], strides = [1, 1]} : vector<64x128xf32> to vector<16x128xf32>
    %c3 = arith.constant 3 : index
    %c0_33 = arith.constant 0 : index
    %82 = memref.load %arg7[%c3, %c0_33] : memref<4x4xf32, #tpu.memory_space<smem>>
    %83 = vector.broadcast %82 : f32 to vector<16x128xf32>
    %84 = arith.mulf %1, %83 : vector<16x128xf32>
    %85 = arith.addf %81, %84 : vector<16x128xf32>
    %c3_34 = arith.constant 3 : index
    %c1_35 = arith.constant 1 : index
    %86 = memref.load %arg7[%c3_34, %c1_35] : memref<4x4xf32, #tpu.memory_space<smem>>
    %87 = vector.broadcast %86 : f32 to vector<16x128xf32>
    %88 = arith.mulf %3, %87 : vector<16x128xf32>
    %89 = arith.addf %85, %88 : vector<16x128xf32>
    %c3_36 = arith.constant 3 : index
    %c2_37 = arith.constant 2 : index
    %90 = memref.load %arg7[%c3_36, %c2_37] : memref<4x4xf32, #tpu.memory_space<smem>>
    %91 = vector.broadcast %90 : f32 to vector<16x128xf32>
    %92 = arith.mulf %5, %91 : vector<16x128xf32>
    %93 = arith.addf %89, %92 : vector<16x128xf32>
    %94 = arith.negf %93 : vector<16x128xf32>
    %95 = math.exp %94 : vector<16x128xf32>
    %cst_38 = arith.constant 1.000000e+00 : f32
    %96 = vector.broadcast %cst_38 : f32 to vector<16x128xf32>
    %97 = arith.addf %96, %95 : vector<16x128xf32>
    %98 = arith.divf %96, %97 : vector<16x128xf32>
    %99 = arith.mulf %93, %98 : vector<16x128xf32>
    %c3_39 = arith.constant 3 : index
    %100 = memref.load %arg8[%c3_39] : memref<4xf32, #tpu.memory_space<smem>>
    %101 = vector.broadcast %100 : f32 to vector<16x128xf32>
    %102 = arith.mulf %99, %101 : vector<16x128xf32>
    %103 = arith.addf %80, %102 : vector<16x128xf32>
    %c0_40 = arith.constant 0 : index
    %104 = memref.load %arg9[%c0_40] : memref<1xf32, #tpu.memory_space<smem>>
    %105 = vector.broadcast %104 : f32 to vector<16x128xf32>
    %106 = arith.addf %103, %105 : vector<16x128xf32>
    %c0_41 = arith.constant 0 : index
    %c0_42 = arith.constant 0 : index
    %107 = vector.load %arg10[%c0_41, %c0_42] : memref<16x128xf32, #tpu.memory_space<vmem>>, vector<16x128xf32>
    tpu.vector_store %arg10[%c0_41, %c0_42], %106 {strides = array<i32>} : memref<16x128xf32, #tpu.memory_space<vmem>>, vector<16x128xf32>,
    return
  }
  func.func @transform_0(%arg0: i32) -> (i32, i32) {
    %c0_i32 = arith.constant 0 : i32
    %c0_i32_0 = arith.constant 0 : i32
    return %arg0, %c0_i32 : i32, i32
  }
  func.func @transform_1(%arg0: i32) -> (i32, i32) {
    %c0_i32 = arith.constant 0 : i32
    %c0_i32_0 = arith.constant 0 : i32
    return %arg0, %c0_i32 : i32, i32
  }
  func.func @transform_2(%arg0: i32) -> (i32, i32) {
    %c0_i32 = arith.constant 0 : i32
    %c0_i32_0 = arith.constant 0 : i32
    return %arg0, %c0_i32 : i32, i32
  }
  func.func @transform_3(%arg0: i32) -> (i32, i32) {
    %c0_i32 = arith.constant 0 : i32
    %c0_i32_0 = arith.constant 0 : i32
    return %arg0, %c0_i32 : i32, i32
  }
  func.func @transform_4(%arg0: i32) -> (i32, i32) {
    %c0_i32 = arith.constant 0 : i32
    %c0_i32_0 = arith.constant 0 : i32
    %c0_i32_1 = arith.constant 0 : i32
    return %c0_i32, %c0_i32_0 : i32, i32
  }
  func.func @transform_5(%arg0: i32) -> (i32, i32) {
    %c0_i32 = arith.constant 0 : i32
    %c0_i32_0 = arith.constant 0 : i32
    %c0_i32_1 = arith.constant 0 : i32
    return %c0_i32, %c0_i32_0 : i32, i32
  }
  func.func @transform_6(%arg0: i32) -> (i32, i32) {
    %c0_i32 = arith.constant 0 : i32
    %c0_i32_0 = arith.constant 0 : i32
    %c0_i32_1 = arith.constant 0 : i32
    return %c0_i32, %c0_i32_0 : i32, i32
  }
  func.func @transform_7(%arg0: i32) -> i32 {
    %c0_i32 = arith.constant 0 : i32
    %c0_i32_0 = arith.constant 0 : i32
    return %c0_i32 : i32
  }
  func.func @transform_8(%arg0: i32) -> i32 {
    %c0_i32 = arith.constant 0 : i32
    %c0_i32_0 = arith.constant 0 : i32
    return %c0_i32 : i32
  }
  func.func @transform_9(%arg0: i32) -> (i32, i32) {
    %c0_i32 = arith.constant 0 : i32
    %c0_i32_0 = arith.constant 0 : i32
    return %c0_i32, %arg0 : i32, i32
  }
}

</mosaic_0001>

<bundles_post_ra>
// kernel: tpu_custom_call.1
= control target key start
LH: loop header
LB: loop body
LE: loop exit
PB: predicated region body
PF: predicated region fallthrough
CT: control target
= control target key end

     0   :  { %15 = vsyncpa [#allocation5], 0  ;;  %s1346_s0 = inlined_call_operand.vmem [shape: f32[2,16], index: 0, kind: input, shape index: {}]   ;;  %s1347_s1 = inlined_call_operand.vmem [shape: f32[2,16], index: 1, kind: input, shape index: {}]   ;;  %s1348_s2 = inlined_call_operand.vmem [shape: f32[2,16], index: 2, kind: input, shape index: {}]   ;;  %s1349_s3 = inlined_call_operand.vmem [shape: f32[2,32], index: 3, kind: input, shape index: {}]   ;;  %s1350_s4 = inlined_call_operand.vmem [shape: f32[64,32], index: 4, kind: input, shape index: {}]   ;;  %s1351_s5 = inlined_call_operand.vmem [shape: f32[64,1], index: 5, kind: input, shape index: {}]   ;;  %s1352_s6 = inlined_call_operand.vmem [shape: f32[4,4], index: 6, kind: input, shape index: {}]   ;;  %s1353_s7 = inlined_call_operand.vmem [shape: f32[4], index: 7, kind: input, shape index: {}]   ;;  %s1354_s8 = inlined_call_operand.<no memory space> [shape: f32[1], index: 8, kind: input, shape index: {}]   ;;  %s1355_s9 = inlined_call_operand.hbm [shape: f32[16,128], index: 9, kind: output, shape index: {}]  }
   0x1   :  { %16 = vsyncpa [#allocation7], 0 }
   0x2   :  { %17 = vsyncpa [#allocation4], 0  ;;  %s36_s11 = sshll.u32 %s1352_s6, 4  ;;  %s46_s14 = sshll.u32 %s1353_s7, 4  ;;  %s37_s11 = int_to_ptr.vmem [resolvable:$true] %s36_s11  ;;  %s47_s14 = int_to_ptr.vmem [resolvable:$true] %s46_s14 }
   0x3   :  { %s845_s15 = scalar_lea.vmem %s37_s11, 64  ;;  %p850_p1 = scmp.lt.s32.totalorder %s37_s11, %s37_s11 }
   0x4   :  { %p846_p0 = scmp.ne.s32.totalorder %s37_s11, %s845_s15  ;;  %p851_p2 = scmp.lt.s32.totalorder %s845_s15, %s845_s15 }
   0x6   :  { %p852_p3 = por %p851_p2, %p850_p1 }
   0x8   :  { %p853_p4 = pnand %p852_p3, %p846_p0 }
   0xa   :  { %856 = shalt.err (!%p853_p4)
}
   0xb   :  { %s897_s16 = smov [#allocation3]   ;;  %s857_s17 = scalar_lea.vmem %s47_s14, 16 }
   0xc   :  { %39 = dma.vmem_to_smem %s37_s11, 64, %s897_s16, [#allocation5]  }
   0xd   :  { %p858_p5 = scmp.ne.s32.totalorder %s47_s14, %s857_s17  ;;  %p862_p6 = scmp.lt.s32.totalorder %s47_s14, %s47_s14 }
   0xe   :  { %p863_p7 = scmp.lt.s32.totalorder %s857_s17, %s857_s17 }
  0x10   :  { %p864_p8 = por %p863_p7, %p862_p6 }
  0x12   :  { %p865_p9 = pnand %p864_p8, %p858_p5 }
  0x14   :  { %868 = shalt.err (!%p865_p9)
}
  0x15   :  { %s898_s6 = smov [#allocation6]  }
  0x16   :  { %49 = dma.vmem_to_smem %s47_s14, 16, %s898_s6, [#allocation7]  }
  0x17   :  { %891 = dma.done.wait [#allocation5], 64  }
  0x18   :  { %892 = vsyncadd [#allocation5], 4294967232 }
  0x19   :  { %893 = dma.done.wait [#allocation7], 16  }
  0x1a   :  { %894 = vsyncadd [#allocation7], 4294967280 }
  0x1b   :  { %58 = sfence }
  0x1c   :  { %v203_v0 = vld [vmem:[%s1349_s3] sm:$0xff]  ;;  %v204_v1 = vld [vmem:[%s1349_s3 + $0x8] sm:$0xff]  ;;  %vm275_vm0 = vcmask 261120   ;;  %v205_v2 = vld [vmem:[%s1349_s3 + $0x10] sm:$0xff]  ;;  %v899_v6 = vmov 0   ;;  %s661_s27 = sld [smem:[#allocation3 + $0x100]] }
  0x1d   :  { %v741_v3 = vpack.c.bf16 %v204_v1, %v203_v0  ;;  %vm970_vm1 = vmpackc.low %vm275_vm0, %vm275_vm0  ;;  %v206_v5 = vld [vmem:[%s1349_s3 + $0x18] sm:$0xff]  ;;  %812 = vset.pattern.permute.xlu1 %v899_v6  ;;  %v228_v7 = vld [vmem:[%s1351_s5 + $0x8] sm:$0xff]  ;;  %s655_s28 = sld [smem:[#allocation3 + $0x80]]  ;;  %s1289_s30 = sld [smem:[#allocation3 + $0x101]] }
  0x1e   :  { %v747_v8 = vpack.c.bf16 %v206_v5, %v205_v2  ;;  %242 = vperm.xlu1 %812, %v228_v7   ;;  %v229_v9 = vld [vmem:[%s1351_s5 + $0x10] sm:$0xff]  ;;  %v59_v10 = vld [vmem:[%s1346_s0] sm:$0xff]  ;;  %v208_v12 = vld [vmem:[%s1349_s3 + $0x28] sm:$0xff]  ;;  %s667_s29 = sld [smem:[#allocation3 + $0x180]]  ;;  %s1291_s10 = sld [smem:[#allocation3 + $0x181]] }
  0x1f   :  { %743 = vmatprep.subr.msk.bf16.mxu0 %vm970_vm1, %v741_v3  ;;  %789 = vmatprep.subr.msk.bf16.mxu1 %vm970_vm1, %v741_v3  ;;  %v207_v11 = vld [vmem:[%s1349_s3 + $0x20] sm:$0xff]  ;;  %v230_v13 = vld [vmem:[%s1351_s5 + $0x18] sm:$0xff]  ;;  %v60_v14 = vld [vmem:[%s1346_s0 + $0x8] sm:$0xff]  ;;  %s1293_s11 = sld [smem:[#allocation3 + $0x2]]  ;;  %s485_s15 = sld [smem:[#allocation6]] }
  0x20   :  { %746 = vmatpush3.bf16.xpose.msk.msra.mxu0 %vm970_vm1, %v741_v3  ;;  %797 = vmatpush3.bf16.xpose.msk.msra.mxu1 %vm970_vm1, %v741_v3  ;;  %v753_v15 = vpack.c.bf16 %v208_v12, %v207_v11  ;;  %v219_v16 = vld [vmem:[%s1350_s4] sm:$0xff]  ;;  %v61_v19 = vld [vmem:[%s1346_s0 + $0x10] sm:$0xff]  ;;  %v210_v21 = vld [vmem:[%s1349_s3 + $0x38] sm:$0xff]  ;;  %s1295_s12 = sld [smem:[#allocation3 + $0x102]]  ;;  %s660_s16 = sld [smem:[#allocation6 + $0x1]] }
  0x21   :  { %749 = vmatprep.subr.msk.bf16.mxu0 %vm970_vm1, %v747_v8  ;;  %790 = vmatprep.subr.msk.bf16.mxu1 %vm970_vm1, %v747_v8  ;;  %v223_v17 = vld [vmem:[%s1350_s4 + $0x20] sm:$0xff]  ;;  %v209_v20 = vld [vmem:[%s1349_s3 + $0x30] sm:$0xff]  ;;  %v62_v23 = vld [vmem:[%s1346_s0 + $0x18] sm:$0xff]  ;;  %s1297_s13 = sld [smem:[#allocation3 + $0x82]]  ;;  %s900_s18 = smov [#allocation8]  }
  0x22   :  { %247 = vperm.xlu1 %812, %v229_v9   ;;  %75 = vxpose.xlu0.b32.start [1/16] (narrow) %v59_v10, 16  ;;  %v231_v18 = vld [vmem:[%s1351_s5 + $0x20] sm:$0xff]  ;;  %v233_v22 = vld [vmem:[%s1351_s5 + $0x30] sm:$0xff]  ;;  %v759_v24 = vpack.c.bf16 %v210_v21, %v209_v20  ;;  %v212_v27 = vld [vmem:[%s1349_s3 + $0x48] sm:$0xff]  ;;  %s1299_s14 = sld [smem:[#allocation3 + $0x182]]  ;;  %s614_s19 = sshll.u32 %s900_s18, 4  ;;  %s615_s19 = int_to_ptr.vmem [resolvable:$true] %s614_s19 }
  0x23   :  { %729 = vmatprep.mubr.msk.f32.mxu0 %vm275_vm0, %v219_v16  ;;  %735 = vmatprep.mubr.msk.f32.mxu1 %vm275_vm0, %v223_v17  ;;  %v63_v25 = vld [vmem:[%s1346_s0 + $0x20] sm:$0xff]  ;;  %v64_v28 = vld [vmem:[%s1346_s0 + $0x28] sm:$0xff]  ;;  %v65_v30 = vld [vmem:[%s1346_s0 + $0x30] sm:$0xff]  ;;  %s666_s17 = sld [smem:[#allocation6 + $0x2]]  ;;  %p874_p11 = scmp.lt.s32.totalorder %s615_s19, %s615_s19 }
  0x24   :  { %v211_v26 = vld [vmem:[%s1349_s3 + $0x40] sm:$0xff]  ;;  %v213_v31 = vld [vmem:[%s1349_s3 + $0x50] sm:$0xff]  ;;  %v214_v32 = vld [vmem:[%s1349_s3 + $0x58] sm:$0xff] }
  0x25   :  { %v765_v29 = vpack.c.bf16 %v212_v27, %v211_v26  ;;  %v66_v33 = vld [vmem:[%s1346_s0 + $0x38] sm:$0xff]  ;;  %v771_v34 = vpack.c.bf16 %v214_v32, %v213_v31  ;;  %v67_v35 = vld [vmem:[%s1346_s0 + $0x40] sm:$0xff]  ;;  %v216_v37 = vld [vmem:[%s1349_s3 + $0x68] sm:$0xff] }
  0x26   :  { %252 = vperm.xlu1 %812, %v230_v13   ;;  %76 = vxpose.xlu0.b32.cont [2/16] (narrow) %v60_v14, 16  ;;  %v215_v36 = vld [vmem:[%s1349_s3 + $0x60] sm:$0xff]  ;;  %v68_v38 = vld [vmem:[%s1346_s0 + $0x48] sm:$0xff]  ;;  %v69_v40 = vld [vmem:[%s1346_s0 + $0x50] sm:$0xff] }
  0x27   :  { %v777_v39 = vpack.c.bf16 %v216_v37, %v215_v36  ;;  %v217_v41 = vld [vmem:[%s1349_s3 + $0x70] sm:$0xff]  ;;  %v218_v42 = vld [vmem:[%s1349_s3 + $0x78] sm:$0xff]  ;;  %v71_v45 = vld [vmem:[%s1346_s0 + $0x60] sm:$0xff]  ;;  %v528_v37 = vstv %s661_s27  ;;  %s869_s3 = scalar_lea.vmem %s615_s19, 256 }
  0x28   :  { %752 = vmatpush3.bf16.xpose.msk.msra.mxu0 %vm970_vm1, %v747_v8  ;;  %798 = vmatpush3.bf16.xpose.msk.msra.mxu1 %vm970_vm1, %v747_v8  ;;  %v70_v43 = vld [vmem:[%s1346_s0 + $0x58] sm:$0xff]  ;;  %v783_v44 = vpack.c.bf16 %v218_v42, %v217_v41  ;;  %v72_v46 = vld [vmem:[%s1346_s0 + $0x68] sm:$0xff]  ;;  %v107_v47 = vld [vmem:[%s1347_s1] sm:$0xff]  ;;  %p870_p10 = scmp.ne.s32.totalorder %s615_s19, %s869_s3  ;;  %p875_p12 = scmp.lt.s32.totalorder %s869_s3, %s869_s3 }
  0x29   :  { %755 = vmatprep.subr.msk.bf16.mxu0 %vm970_vm1, %v753_v15  ;;  %791 = vmatprep.subr.msk.bf16.mxu1 %vm970_vm1, %v753_v15  ;;  %v73_v48 = vld [vmem:[%s1346_s0 + $0x70] sm:$0xff]  ;;  %v108_v49 = vld [vmem:[%s1347_s1 + $0x8] sm:$0xff]  ;;  %v74_v50 = vld [vmem:[%s1346_s0 + $0x78] sm:$0xff]  ;;  %s1324_s0 = sld [smem:[#allocation6 + $0x3]] }
  0x2a   :  { %257 = vperm.xlu1 %812, %v231_v18   ;;  %77 = vxpose.xlu0.b32.cont [3/16] (narrow) %v61_v19, 16  ;;  %v220_v51 = vld [vmem:[%s1350_s4 + $0x8] sm:$0xff]  ;;  %v221_v53 = vld [vmem:[%s1350_s4 + $0x10] sm:$0xff]  ;;  %v222_v56 = vld [vmem:[%s1350_s4 + $0x18] sm:$0xff]  ;;  %p876_p13 = por %p875_p12, %p874_p11 }
  0x2b   :  { %v224_v52 = vld [vmem:[%s1350_s4 + $0x28] sm:$0xff]  ;;  %v225_v54 = vld [vmem:[%s1350_s4 + $0x30] sm:$0xff]  ;;  %v226_v57 = vld [vmem:[%s1350_s4 + $0x38] sm:$0xff] }
  0x2c   :  { %v109_v55 = vld [vmem:[%s1347_s1 + $0x10] sm:$0xff]  ;;  %v110_v58 = vld [vmem:[%s1347_s1 + $0x18] sm:$0xff]  ;;  %v111_v59 = vld [vmem:[%s1347_s1 + $0x20] sm:$0xff]  ;;  %p877_p0 = pnand %p876_p13, %p870_p10 }
  0x2d   :  { %v112_v60 = vld [vmem:[%s1347_s1 + $0x28] sm:$0xff]  ;;  %v113_v61 = vld [vmem:[%s1347_s1 + $0x30] sm:$0xff]  ;;  %v114_v62 = vld [vmem:[%s1347_s1 + $0x38] sm:$0xff] }
  0x2e   :  { %267 = vperm.xlu1 %812, %v233_v22   ;;  %78 = vxpose.xlu0.b32.cont [4/16] (narrow) %v62_v23, 16  ;;  %v115_v63 = vld [vmem:[%s1347_s1 + $0x40] sm:$0xff]  ;;  %v116_v0 = vld [vmem:[%s1347_s1 + $0x48] sm:$0xff]  ;;  %v117_v1 = vld [vmem:[%s1347_s1 + $0x50] sm:$0xff] }
  0x2f   :  { %v118_v2 = vld [vmem:[%s1347_s1 + $0x58] sm:$0xff]  ;;  %v227_v3 = vld [vmem:[%s1351_s5] sm:$0xff]  ;;  %v232_v5 = vld [vmem:[%s1351_s5 + $0x28] sm:$0xff] }
  0x30   :  { %758 = vmatpush3.bf16.xpose.msk.msra.mxu0 %vm970_vm1, %v753_v15  ;;  %799 = vmatpush3.bf16.xpose.msk.msra.mxu1 %vm970_vm1, %v753_v15  ;;  %v119_v4 = vld [vmem:[%s1347_s1 + $0x60] sm:$0xff]  ;;  %v120_v7 = vld [vmem:[%s1347_s1 + $0x68] sm:$0xff]  ;;  %v234_v8 = vld [vmem:[%s1351_s5 + $0x38] sm:$0xff]  ;;  %s453_s5 = sld [smem:[#allocation3]] }
  0x31   :  { %761 = vmatprep.subr.msk.bf16.mxu0 %vm970_vm1, %v759_v24  ;;  %792 = vmatprep.subr.msk.bf16.mxu1 %vm970_vm1, %v759_v24  ;;  %v122_v9 = vld [vmem:[%s1347_s1 + $0x78] sm:$0xff]  ;;  %v155_v10 = vld [vmem:[%s1348_s2] sm:$0xff]  ;;  %v156_v11 = vld [vmem:[%s1348_s2 + $0x8] sm:$0xff] }
  0x32   :  { %79 = vxpose.xlu0.b32.cont [5/16] (narrow) %v63_v25, 16  ;;  %v157_v12 = vld [vmem:[%s1348_s2 + $0x10] sm:$0xff]  ;;  %v158_v13 = vld [vmem:[%s1348_s2 + $0x18] sm:$0xff]  ;;  %v159_v14 = vld [vmem:[%s1348_s2 + $0x20] sm:$0xff] }
  0x33   :  { %v160_v15 = vld [vmem:[%s1348_s2 + $0x28] sm:$0xff]  ;;  %v161_v16 = vld [vmem:[%s1348_s2 + $0x30] sm:$0xff]  ;;  %v162_v17 = vld [vmem:[%s1348_s2 + $0x38] sm:$0xff] }
  0x34   :  { %v163_v18 = vld [vmem:[%s1348_s2 + $0x40] sm:$0xff]  ;;  %v164_v19 = vld [vmem:[%s1348_s2 + $0x48] sm:$0xff]  ;;  %v165_v20 = vld [vmem:[%s1348_s2 + $0x50] sm:$0xff] }
  0x35   :  { %v166_v21 = vld [vmem:[%s1348_s2 + $0x58] sm:$0xff]  ;;  %v167_v22 = vld [vmem:[%s1348_s2 + $0x60] sm:$0xff]  ;;  %v168_v23 = vld [vmem:[%s1348_s2 + $0x68] sm:$0xff] }
  0x36   :  { %80 = vxpose.xlu0.b32.cont [6/16] (narrow) %v64_v28, 16  ;;  %v170_v25 = vld [vmem:[%s1348_s2 + $0x78] sm:$0xff]  ;;  %v454_v36 = vstv %s453_s5 }
  0x38   :  { %764 = vmatpush3.bf16.xpose.msk.msra.mxu0 %vm970_vm1, %v759_v24  ;;  %800 = vmatpush3.bf16.xpose.msk.msra.mxu1 %vm970_vm1, %v759_v24  ;;  %v169_v24 = vld [vmem:[%s1348_s2 + $0x70] sm:$0xff]  ;;  %s1287_s2 = sld [smem:[#allocation3 + $0x81]] }
  0x39   :  { %767 = vmatprep.subr.msk.bf16.mxu0 %vm970_vm1, %v765_v29  ;;  %793 = vmatprep.subr.msk.bf16.mxu1 %vm970_vm1, %v765_v29 }
  0x3a   :  { %81 = vxpose.xlu0.b32.cont [7/16] (narrow) %v65_v30, 16 }
  0x3e   :  { %82 = vxpose.xlu0.b32.cont [8/16] (narrow) %v66_v33, 16  ;;  %v496_v42 = vstv %s1287_s2 }
  0x40   :  { %770 = vmatpush3.bf16.xpose.msk.msra.mxu0 %vm970_vm1, %v765_v29  ;;  %801 = vmatpush3.bf16.xpose.msk.msra.mxu1 %vm970_vm1, %v765_v29 }
  0x41   :  { %773 = vmatprep.subr.msk.bf16.mxu0 %vm970_vm1, %v771_v34  ;;  %794 = vmatprep.subr.msk.bf16.mxu1 %vm970_vm1, %v771_v34 }
  0x42   :  { %83 = vxpose.xlu0.b32.cont [9/16] (narrow) %v67_v35, 16 }
  0x46   :  { %84 = vxpose.xlu0.b32.cont [10/16] (narrow) %v68_v38, 16 }
  0x48   :  { %776 = vmatpush3.bf16.xpose.msk.msra.mxu0 %vm970_vm1, %v771_v34  ;;  %802 = vmatpush3.bf16.xpose.msk.msra.mxu1 %vm970_vm1, %v771_v34 }
  0x49   :  { %779 = vmatprep.subr.msk.bf16.mxu0 %vm970_vm1, %v777_v39  ;;  %795 = vmatprep.subr.msk.bf16.mxu1 %vm970_vm1, %v777_v39 }
  0x4a   :  { %85 = vxpose.xlu0.b32.cont [11/16] (narrow) %v69_v40, 16  ;;  %v566_v40 = vstv %s667_s29 }
  0x4e   :  { %86 = vxpose.xlu0.b32.cont [12/16] (narrow) %v70_v43, 16  ;;  %v534_v43 = vstv %s1289_s30 }
  0x50   :  { %782 = vmatpush3.bf16.xpose.msk.msra.mxu0 %vm970_vm1, %v777_v39  ;;  %803 = vmatpush3.bf16.xpose.msk.msra.mxu1 %vm970_vm1, %v777_v39  ;;  %v490_v39 = vstv %s655_s28 }
  0x51   :  { %785 = vmatprep.subr.msk.bf16.mxu0 %vm970_vm1, %v783_v44  ;;  %796 = vmatprep.subr.msk.bf16.mxu1 %vm970_vm1, %v783_v44 }
  0x52   :  { %87 = vxpose.xlu0.b32.cont [13/16] (narrow) %v71_v45, 16 }
  0x56   :  { %88 = vxpose.xlu0.b32.cont [14/16] (narrow) %v72_v46, 16 }
  0x57   :  { %123 = vxpose.xlu1.b32.start [1/16] (narrow) %v107_v47, 16 }
  0x58   :  { %788 = vmatpush3.bf16.xpose.msk.msra.mxu0 %vm970_vm1, %v783_v44  ;;  %804 = vmatpush3.bf16.xpose.msk.msra.mxu1 %vm970_vm1, %v783_v44  ;;  %v572_v44 = vstv %s1291_s10 }
  0x5a   :  { %89 = vxpose.xlu0.b32.cont [15/16] (narrow) %v73_v48, 16 }
  0x5b   :  { %124 = vxpose.xlu1.b32.cont [2/16] (narrow) %v108_v49, 16 }
  0x5e   :  { %90 = vxpose.xlu0.b32.end [16/16] (narrow) %v74_v50, 16 }
  0x5f   :  { %730 = vmatmul.mubr.msk.f32.vlgmr.msra.gmra.mrb[0].mxu0 %vm275_vm0, %v220_v51  ;;  %736 = vmatmul.mubr.msk.f32.vlgmr.msra.gmra.mrb[0].mxu1 %vm275_vm0, %v224_v52 }
  0x60   :  { %732 = vmatprep.mubr.msk.f32.mxu0 %vm275_vm0, %v221_v53  ;;  %738 = vmatprep.mubr.msk.f32.mxu1 %vm275_vm0, %v225_v54  ;;  %v466_v54 = vstv %s1293_s11 }
  0x61   :  { %125 = vxpose.xlu1.b32.cont [3/16] (narrow) %v109_v55, 16  ;;  %v502_v55 = vstv %s1297_s13 }
  0x63   :  { %733 = vmatmul.mubr.msk.f32.gmra.mrb[2].mxu0 %vm275_vm0, %v222_v56  ;;  %739 = vmatmul.mubr.msk.f32.gmra.mrb[2].mxu1 %vm275_vm0, %v226_v57  ;;  %v540_v56 = vstv %s1295_s12  ;;  %v578_v57 = vstv %s1299_s14 }
  0x65   :  { %126 = vxpose.xlu1.b32.cont [4/16] (narrow) %v110_v58, 16 }
  0x69   :  { %127 = vxpose.xlu1.b32.cont [5/16] (narrow) %v111_v59, 16 }
  0x6d   :  { %128 = vxpose.xlu1.b32.cont [6/16] (narrow) %v112_v60, 16 }
  0x71   :  { %129 = vxpose.xlu1.b32.cont [7/16] (narrow) %v113_v61, 16 }
  0x75   :  { %130 = vxpose.xlu1.b32.cont [8/16] (narrow) %v114_v62, 16 }
  0x79   :  { %131 = vxpose.xlu1.b32.cont [9/16] (narrow) %v115_v63, 16 }
  0x7d   :  { %132 = vxpose.xlu1.b32.cont [10/16] (narrow) %v116_v0, 16 }
  0x81   :  { %133 = vxpose.xlu1.b32.cont [11/16] (narrow) %v117_v1, 16 }
  0x85   :  { %134 = vxpose.xlu1.b32.cont [12/16] (narrow) %v118_v2, 16 }
  0x87   :  { %811 = vset.pattern.permute.xlu0 %v899_v6  ;;  %v121_v6 = vld [vmem:[%s1347_s1 + $0x70] sm:$0xff]  ;;  %s1285_s1 = sld [smem:[#allocation3 + $0x1]] }
  0x88   :  { %237 = vperm.xlu0 %811, %v227_v3  }
  0x89   :  { %135 = vxpose.xlu1.b32.cont [13/16] (narrow) %v119_v4, 16 }
  0x8c   :  { %262 = vperm.xlu0 %811, %v232_v5  }
  0x8d   :  { %136 = vxpose.xlu1.b32.cont [14/16] (narrow) %v120_v7, 16  ;;  %v460_v41 = vstv %s1285_s1 }
  0x90   :  { %272 = vperm.xlu0 %811, %v234_v8  }
  0x91   :  { %137 = vxpose.xlu1.b32.cont [15/16] (narrow) %v121_v6, 16 }
  0x95   :  { %138 = vxpose.xlu1.b32.end [16/16] (narrow) %v122_v9, 16 }
  0x99   :  { %171 = vxpose.xlu1.b32.start [1/16] (narrow) %v155_v10, 16 }
  0x9d   :  { %172 = vxpose.xlu1.b32.cont [2/16] (narrow) %v156_v11, 16  ;;  %v243_v26 = vpop.permute.xlu1 %242 }
  0xa1   :  { %173 = vxpose.xlu1.b32.cont [3/16] (narrow) %v157_v12, 16  ;;  %v1279_v27 = vpop.permute.xlu1 %247 }
  0xa2   :  { %v91_v31 = vpop.trf.xlu0 }
  0xa3   :  { %v455_v45 = vmul.f32 %v454_v36, %v91_v31  ;;  %v529_v46 = vmul.f32 %v528_v37, %v91_v31  ;;  %v491_v47 = vmul.f32 %v490_v39, %v91_v31  ;;  %v567_v48 = vmul.f32 %v566_v40, %v91_v31 }
  0xa5   :  { %174 = vxpose.xlu1.b32.cont [4/16] (narrow) %v158_v13, 16  ;;  %v1281_v28 = vpop.permute.xlu1 %252 }
  0xa6   :  { %v92_v33 = vpop.trf.xlu0 }
  0xa7   :  { %v456_v50 = vmul.f32 %v454_v36, %v92_v33  ;;  %v530_v51 = vmul.f32 %v528_v37, %v92_v33  ;;  %v492_v52 = vmul.f32 %v490_v39, %v92_v33  ;;  %v568_v53 = vmul.f32 %v566_v40, %v92_v33 }
  0xa9   :  { %175 = vxpose.xlu1.b32.cont [5/16] (narrow) %v159_v14, 16  ;;  %v258_v29 = vpop.permute.xlu1 %257 }
  0xad   :  { %176 = vxpose.xlu1.b32.cont [6/16] (narrow) %v160_v15, 16  ;;  %v1283_v30 = vpop.permute.xlu1 %267 }
  0xb1   :  { %177 = vxpose.xlu1.b32.cont [7/16] (narrow) %v161_v16, 16 }
  0xb5   :  { %178 = vxpose.xlu1.b32.cont [8/16] (narrow) %v162_v17, 16 }
  0xb9   :  { %179 = vxpose.xlu1.b32.cont [9/16] (narrow) %v163_v18, 16 }
  0xbd   :  { %180 = vxpose.xlu1.b32.cont [10/16] (narrow) %v164_v19, 16 }
  0xc1   :  { %181 = vxpose.xlu1.b32.cont [11/16] (narrow) %v165_v20, 16 }
  0xc5   :  { %182 = vxpose.xlu1.b32.cont [12/16] (narrow) %v166_v21, 16 }
  0xc9   :  { %183 = vxpose.xlu1.b32.cont [13/16] (narrow) %v167_v22, 16 }
  0xcd   :  { %184 = vxpose.xlu1.b32.cont [14/16] (narrow) %v168_v23, 16 }
  0xd1   :  { %185 = vxpose.xlu1.b32.cont [15/16] (narrow) %v169_v24, 16 }
  0xd5   :  { %186 = vxpose.xlu1.b32.end [16/16] (narrow) %v170_v25, 16 }
  0xd9   :  { %v139_v32 = vpop.trf.xlu1 }
  0xda   :  { %v461_v58 = vmul.f32 %v460_v41, %v139_v32  ;;  %v497_v59 = vmul.f32 %v496_v42, %v139_v32  ;;  %v535_v60 = vmul.f32 %v534_v43, %v139_v32  ;;  %v573_v61 = vmul.f32 %v572_v44, %v139_v32 }
  0xdd   :  { %v140_v34 = vpop.trf.xlu1 }
  0xde   :  { %v462_v63 = vmul.f32 %v460_v41, %v140_v34  ;;  %v498_v0 = vmul.f32 %v496_v42, %v140_v34  ;;  %v536_v1 = vmul.f32 %v534_v43, %v140_v34  ;;  %v574_v2 = vmul.f32 %v572_v44, %v140_v34 }
 0x107   :  { %v238_v35 = vpop.permute.xlu0 %237 }
 0x10b   :  { %v263_v49 = vpop.permute.xlu0 %262 }
 0x10f   :  { %v273_v17 = vpop.permute.xlu0 %272 }
 0x119   :  { %v187_v38 = vpop.trf.xlu1 }
 0x11a   :  { %v467_v9 = vmul.f32 %v466_v54, %v187_v38  ;;  %v503_v10 = vmul.f32 %v502_v55, %v187_v38  ;;  %v541_v13 = vmul.f32 %v540_v56, %v187_v38  ;;  %v579_v14 = vmul.f32 %v578_v57, %v187_v38 }
 0x11d   :  { %v188_v62 = vpop.trf.xlu1 }
 0x11e   :  { %v468_v18 = vmul.f32 %v466_v54, %v188_v62  ;;  %v542_v19 = vmul.f32 %v540_v56, %v188_v62  ;;  %v504_v24 = vmul.f32 %v502_v55, %v188_v62  ;;  %v580_v25 = vmul.f32 %v578_v57, %v188_v62 }
 0x132   :  { %v731_v3 = vpop.f32.mrb[0].mxu0  ;;  %v737_v4 = vpop.f32.mrb[0].mxu1 }
 0x133   :  { %v420_v5 = vadd.f32 %v731_v3, %v243_v26  ;;  %v440_v7 = vadd.f32 %v737_v4, %v263_v49  ;;  %v414_v8 = vpop.f32.mrb[1].mxu0  ;;  %v434_v6 = vpop.f32.mrb[1].mxu1 }
 0x134   :  { %v415_v11 = vadd.f32 %v414_v8, %v238_v35  ;;  %v435_v12 = vadd.f32 %v434_v6, %v258_v29 }
 0x135   :  { %v458_v15 = vadd.f32 %v456_v50, %v420_v5  ;;  %v532_v16 = vadd.f32 %v530_v51, %v440_v7 }
 0x136   :  { %v457_v20 = vadd.f32 %v455_v45, %v415_v11  ;;  %v531_v21 = vadd.f32 %v529_v46, %v435_v12  ;;  %v734_v22 = vpop.f32.mrb[2].mxu0  ;;  %v740_v23 = vpop.f32.mrb[2].mxu1 }
 0x137   :  { %v464_v26 = vadd.f32 %v462_v63, %v458_v15  ;;  %v538_v31 = vadd.f32 %v536_v1, %v532_v16  ;;  %v430_v32 = vadd.f32 %v734_v22, %v1281_v28  ;;  %v450_v33 = vadd.f32 %v740_v23, %v273_v17  ;;  %v424_v34 = vpop.f32.mrb[3].mxu0  ;;  %v444_v29 = vpop.f32.mrb[3].mxu1 }
 0x138   :  { %v463_v35 = vadd.f32 %v461_v58, %v457_v20  ;;  %v537_v36 = vadd.f32 %v535_v60, %v531_v21  ;;  %v425_v37 = vadd.f32 %v424_v34, %v1279_v27  ;;  %v445_v38 = vadd.f32 %v444_v29, %v1283_v30 }
 0x139   :  { %v494_v39 = vadd.f32 %v492_v52, %v430_v32  ;;  %v570_v40 = vadd.f32 %v568_v53, %v450_v33  ;;  %v470_v41 = vadd.f32 %v468_v18, %v464_v26  ;;  %v1312_v42 = vadd.f32 %v542_v19, %v538_v31 }
 0x13a   :  { %v1314_v43 = vadd.f32 %v467_v9, %v463_v35  ;;  %v1316_v44 = vadd.f32 %v541_v13, %v537_v36  ;;  %v493_v45 = vadd.f32 %v491_v47, %v425_v37  ;;  %v569_v28 = vadd.f32 %v567_v48, %v445_v38 }
 0x13b   :  { %v500_v46 = vadd.f32 %v498_v0, %v494_v39  ;;  %v576_v49 = vadd.f32 %v574_v2, %v570_v40  ;;  %v654_v50 = vmul.f32 -1.442695, %v470_v41  ;;  %v665_v51 = vmul.f32 -1.442695, %v1312_v42 }
 0x13c   :  { %v653_v27 = vmul.f32 -1.442695, %v1314_v43  ;;  %v664_v30 = vmul.f32 -1.442695, %v1316_v44  ;;  %v499_v52 = vadd.f32 %v497_v59, %v493_v45  ;;  %v575_v53 = vadd.f32 %v573_v61, %v569_v28 }
 0x13d   :  { %813 = vpow2.f32 %v654_v50  ;;  %v506_v54 = vadd.f32 %v504_v24, %v500_v46  ;;  %v582_v55 = vadd.f32 %v580_v25, %v576_v49  ;;  %v486_v17 = vstv %s485_s15 }
 0x13e   :  { %815 = vpow2.f32 %v653_v27  ;;  %v505_v56 = vadd.f32 %v503_v10, %v499_v52  ;;  %v1321_v57 = vadd.f32 %v579_v14, %v575_v53  ;;  %v522_v19 = vstv %s660_s16 }
 0x13f   :  { %v659_v47 = vmul.f32 -1.442695, %v506_v54  ;;  %817 = vpow2.f32 %v664_v30  ;;  %v671_v48 = vmul.f32 -1.442695, %v582_v55  ;;  %v560_v25 = vstv %s666_s17 }
 0x140   :  { %819 = vpow2.f32 %v665_v51  ;;  %v658_v58 = vmul.f32 -1.442695, %v505_v56  ;;  %v670_v60 = vmul.f32 -1.442695, %v1321_v57  ;;  %v598_v35 = vstv %s1324_s0 }
 0x141   :  { %821 = vpow2.f32 %v659_v47  ;;  %v604_v28 = vstv %s1354_s8 }
 0x142   :  { %823 = vpow2.f32 %v671_v48 }
 0x143   :  { %825 = vpow2.f32 %v658_v58 }
 0x144   :  { %827 = vpow2.f32 %v670_v60 }
 0x147   :  { %v814_v59 = vpop.eup %813 }
 0x148   :  { %v816_v61 = vpop.eup %815  ;;  %v478_v62 = vadd.f32 1.0, %v814_v59 }
 0x149   :  { %v818_v63 = vpop.eup %817  ;;  %v477_v0 = vadd.f32 1.0, %v816_v61 }
 0x14a   :  { %v820_v1 = vpop.eup %819  ;;  %829 = vrcp.f32 %v478_v62  ;;  %v551_v2 = vadd.f32 1.0, %v818_v63 }
 0x14b   :  { %v822_v3 = vpop.eup %821  ;;  %831 = vrcp.f32 %v477_v0  ;;  %v552_v4 = vadd.f32 1.0, %v820_v1 }
 0x14c   :  { %v824_v5 = vpop.eup %823  ;;  %v514_v7 = vadd.f32 1.0, %v822_v3  ;;  %833 = vrcp.f32 %v551_v2 }
 0x14d   :  { %v826_v8 = vpop.eup %825  ;;  %835 = vrcp.f32 %v552_v4  ;;  %v590_v6 = vadd.f32 1.0, %v824_v5 }
 0x14e   :  { %v828_v9 = vpop.eup %827  ;;  %837 = vrcp.f32 %v514_v7  ;;  %v513_v10 = vadd.f32 1.0, %v826_v8 }
 0x14f   :  { %839 = vrcp.f32 %v590_v6  ;;  %v589_v11 = vadd.f32 1.0, %v828_v9 }
 0x150   :  { %841 = vrcp.f32 %v513_v10 }
 0x151   :  { %843 = vrcp.f32 %v589_v11 }
 0x154   :  { %v830_v12 = vpop.eup %829 }
 0x155   :  { %v832_v13 = vpop.eup %831  ;;  %v484_v15 = vmul.f32 %v830_v12, %v470_v41 }
 0x156   :  { %v834_v14 = vpop.eup %833  ;;  %v483_v20 = vmul.f32 %v832_v13, %v1314_v43 }
 0x157   :  { %v836_v16 = vpop.eup %835  ;;  %v488_v26 = vmul.f32 %v486_v17, %v484_v15  ;;  %v557_v33 = vmul.f32 %v834_v14, %v1316_v44 }
 0x158   :  { %v838_v18 = vpop.eup %837  ;;  %v558_v23 = vmul.f32 %v836_v16, %v1312_v42  ;;  %v487_v36 = vmul.f32 %v486_v17, %v483_v20 }
 0x159   :  { %v840_v21 = vpop.eup %839  ;;  %v520_v22 = vmul.f32 %v838_v18, %v506_v54  ;;  %v561_v41 = vmul.f32 %v560_v25, %v557_v33 }
 0x15a   :  { %v842_v24 = vpop.eup %841  ;;  %v596_v34 = vmul.f32 %v840_v21, %v582_v55  ;;  %v562_v38 = vmul.f32 %v560_v25, %v558_v23 }
 0x15b   :  { %v844_v31 = vpop.eup %843  ;;  %v524_v32 = vmul.f32 %v522_v19, %v520_v22  ;;  %v519_v29 = vmul.f32 %v842_v24, %v505_v56 }
 0x15c   :  { %v595_v40 = vmul.f32 %v844_v31, %v1321_v57  ;;  %v600_v43 = vmul.f32 %v598_v35, %v596_v34 }
 0x15d   :  { %v526_v37 = vadd.f32 %v524_v32, %v488_v26  ;;  %v523_v39 = vmul.f32 %v522_v19, %v519_v29 }
 0x15e   :  { %v599_v49 = vmul.f32 %v598_v35, %v595_v40 }
 0x15f   :  { %v525_v45 = vadd.f32 %v523_v39, %v487_v36  ;;  %v564_v42 = vadd.f32 %v562_v38, %v526_v37 }
 0x161   :  { %v563_v46 = vadd.f32 %v561_v41, %v525_v45  ;;  %v602_v44 = vadd.f32 %v600_v43, %v564_v42 }
 0x163   :  { %v601_v50 = vadd.f32 %v599_v49, %v563_v46  ;;  %v606_v51 = vadd.f32 %v604_v28, %v602_v44 }
 0x165   :  { %v605_v27 = vadd.f32 %v604_v28, %v601_v50  ;;  %608 = vst [vmem:[#allocation8 + $0x8] sm:$0xff] %v606_v51 }
 0x167   :  { %607 = vst [vmem:[#allocation8] sm:$0xff] %v605_v27 }
 0x168   :  { %880 = shalt.err (!%p877_p0)
}
 0x169   :  { %s881_s21 = scalar_lea.hbm %s1355_s9, 256 }
 0x16a   :  { %p882_p1 = scmp.ne.s32.totalorder %s1355_s9, %s881_s21  ;;  %p885_p2 = scmp.lt.u32.totalorder %s881_s21, %s1355_s9 }
 0x16c   :  { %p887_p3 = pnand %p885_p2, %p882_p1 }
 0x16e   :  { %890 = shalt.err (!%p887_p3)
}
 0x16f   :  { %s901_s25 = smov 128   ;;  %s902_s26 = smov 8  }
 0x170   :  { %620 = dma.vmem_to_hbm [thread:$0]  %s615_s19, 256, %s1355_s9, [#allocation4], %s901_s25, %s901_s25, %s902_s26  }
 0x171   :  { %895 = dma.done.wait [#allocation4], 256  }
 0x172   :  { %896 = vsyncadd [#allocation4], 4294967040 }
 0x173   :  { %624 = vsyncpa [#allocation4], 1 }
 0x174   :  { %625 = vsyncpa [#allocation5], 1 }
 0x175   :  { %626 = vsyncpa [#allocation7], 1 }

</bundles_post_ra>
